<compile_context>
chip_gen: v7x
topology: tpu7x:2x2x1
jax: 0.10.0
libtpu: 0.0.40
codegen_flags: <defaults>
</compile_context>

<pallas_src>
import numpy as np
import jax
import jax.numpy as jnp
from jax.experimental import pallas as pl
from jax.experimental.pallas import tpu as pltpu

PDF_IN = 2049    # pdf_proj input dim  (nn.Linear(2049, 64))
PDF_OUT = 64
LAN_IN = 512     # lan_proj input dim  (nn.Linear(512, 32))
LAN_OUT = 32
CAT_OUT = PDF_OUT + LAN_OUT   # 96
OUT_PAD = 128                 # lane-dense padded output width (unmasked stores)


def _round_up(x, m):
    return (x + m - 1) // m * m


def _choose_tile(n, tile_n):
    """Sublane-aligned row tile.  When n <= tile_n, split into (at least) two
    grid steps so the "parallel" grid axis can shard across both v7x TCs."""
    tile_n = max(8, _round_up(tile_n, 8))
    if n <= tile_n:
        tile = _round_up(max(-(-n // 2), 1), 8)   # ceil(n/2), rounded up to 8
    else:
        tile = tile_n
    return max(8, min(tile, _round_up(n, 8)))


def _pvn_proj_kernel(x_ref, w_ref, bias_ref, out_ref):
    """out = x @ W_pad + bias_row : one MXU matmul (bf16 in, f32 acc), one full
    128-lane store."""
    acc = jnp.dot(x_ref[...], w_ref[...], preferred_element_type=jnp.float32)
    out_ref[...] = (acc + bias_ref[...]).astype(out_ref.dtype)


def pvn_proj(x, w_pad, bias_row, *, tile_n=1024, out_dtype=jnp.float32):
    """x: (n, 2049) -> (n, 128) = x @ w_pad + bias_row (broadcast over rows).

    x / w_pad are expected in bf16 (compute dtype); bias_row stays f32.
    w_pad:    (2049, 128) with cols [0:64] = W_pdf and cols [64:128] = 0
    bias_row: (1, 128)    with [0:64] = b_pdf, [64:96] = lan_proj(lan_emd), rest 0
    """
    n = x.shape[0]
    tile = _choose_tile(n, tile_n)
    grid = (pl.cdiv(n, tile),)               # ragged tail handled by Pallas

    x_bytes = jnp.dtype(x.dtype).itemsize
    w_bytes = jnp.dtype(w_pad.dtype).itemsize
    b_bytes = jnp.dtype(bias_row.dtype).itemsize
    o_bytes = jnp.dtype(out_dtype).itemsize

    cost = pl.CostEstimate(
        flops=2 * n * PDF_IN * OUT_PAD,
        transcendentals=0,
        bytes_accessed=(n * PDF_IN * x_bytes          # input stream (bf16)
                        + PDF_IN * OUT_PAD * w_bytes  # fused weight (bf16, once)
                        + OUT_PAD * b_bytes           # bias row
                        + n * OUT_PAD * o_bytes),     # output writeback
    )

    # double-buffered x tile + output tile, single-buffered resident weight,
    # plus headroom for compiler scratch; capped for v7x's 64 MiB per-TC VMEM.
    vmem_limit = int(min(max(
        2 * tile * PDF_IN * x_bytes
        + PDF_IN * OUT_PAD * w_bytes
        + 2 * tile * OUT_PAD * o_bytes
        + (4 << 20),
        16 << 20), 48 << 20))

    return pl.pallas_call(
        _pvn_proj_kernel,
        out_shape=jax.ShapeDtypeStruct((n, OUT_PAD), out_dtype),
        grid=grid,
        in_specs=[
            # points tile: the dominant HBM stream, double-buffered by default
            pl.BlockSpec((tile, PDF_IN), lambda i: (i, 0)),
            # fused weight: constant index_map -> resident, single-buffered
            pl.BlockSpec((PDF_IN, OUT_PAD), lambda i: (0, 0),
                         pipeline_mode=pl.Buffered(1)),
            # fused bias row: resident, single-buffered
            pl.BlockSpec((1, OUT_PAD), lambda i: (0, 0),
                         pipeline_mode=pl.Buffered(1)),
        ],
        out_specs=pl.BlockSpec((tile, OUT_PAD), lambda i: (i, 0)),
        compiler_params=pltpu.CompilerParams(
            dimension_semantics=("parallel",),   # shards row tiles across v7x TCs
            vmem_limit_bytes=vmem_limit,
        ),
        cost_estimate=cost,
    )(x, w_pad, bias_row)


def prepare_proj_consts(params, lan_emd, *, compute_dtype=jnp.bfloat16):
    """Build the fused weight / bias ONCE (hoisted out of the forward):
       W_pad[:, :64] = W_pdf ; bias[:64] = b_pdf ; bias[64:96] = lan_emd @ W_lan + b_lan.
    The 512x32 lan_proj matmul is tiny and done here in f32."""
    w_pad = (jnp.zeros((PDF_IN, OUT_PAD), jnp.float32)
             .at[:, :PDF_OUT].set(params["w_pdf"])
             .astype(compute_dtype))
    lan_p = lan_emd.astype(jnp.float32) @ params["w_lan"] + params["b_lan"]   # (1, 32)
    bias_row = (jnp.zeros((1, OUT_PAD), jnp.float32)
                .at[:, :PDF_OUT].set(params["b_pdf"])
                .at[:, PDF_OUT:CAT_OUT].set(lan_p))        # kept f32 (512 B)
    return w_pad, bias_row


def pvcnn_pvn_forward(x_input, p0, t, mask, lan_emd, pdf_a, pdf_b, params, *,
                      proj_consts=None, tile_n=1024, compute_dtype=jnp.bfloat16):
    """Mirror of PVCNNPVN.forward for the parts whose source is available.

    pdf_a / pdf_b stand in for p0_encoder(p0[mask==k])['features'].squeeze(0);
    ideally they already arrive in bf16 (cast at the producer).
    Returns the `pdf` branch: cat(pdf_proj(pdf_scattered), lan_proj(lan_emd).repeat(N,1)).
    """
    n = int(mask.shape[0])
    mask_np = np.asarray(mask)
    idx_a = np.where(mask_np == 0)[0]
    idx_b = np.where(mask_np == 1)[0]

    if proj_consts is None:
        proj_consts = prepare_proj_consts(params, lan_emd, compute_dtype=compute_dtype)
    w_pad, bias_row = proj_consts

    # Project the contiguous encoder outputs directly (no (N, 2049) scatter
    # round-trip), scatter the lane-dense 128-wide slabs by mask, and slice to
    # 96 columns exactly once at the end.
    pdf128 = jnp.zeros((n, OUT_PAD), jnp.float32)
    for idx, grp in ((idx_a, pdf_a), (idx_b, pdf_b)):
        if idx.size:
            g = grp if grp.dtype == w_pad.dtype else grp.astype(w_pad.dtype)
            out_g = pvn_proj(g, w_pad, bias_row, tile_n=tile_n)
            pdf128 = pdf128.at[idx].set(out_g)
    pdf = pdf128[:, :CAT_OUT]

    # --- x = x_input.unsqueeze(0).permute(0,2,1) ; out, _ = self.pvcnn(...) ---
    # TODO(synk): PVCNN2Base forward (SA/FP blocks) source not provided; only the
    # faithfully-implemented `pdf` branch of the return tuple is computed.
    return pdf


def init_params(key):
    k1, k2, k3, k4 = jax.random.split(key, 4)
    bp = 1.0 / np.sqrt(PDF_IN)
    bl = 1.0 / np.sqrt(LAN_IN)
    return {
        # stored as (C_in, C_out): x @ W + b  ==  PyTorch x @ W.T + b with W:(out,in)
        "w_pdf": jax.random.uniform(k1, (PDF_IN, PDF_OUT), jnp.float32, -bp, bp),
        "b_pdf": jax.random.uniform(k2, (1, PDF_OUT), jnp.float32, -bp, bp),
        "w_lan": jax.random.uniform(k3, (LAN_IN, LAN_OUT), jnp.float32, -bl, bl),
        "b_lan": jax.random.uniform(k4, (1, LAN_OUT), jnp.float32, -bl, bl),
    }


if __name__ == "__main__":
    N = 200                     # number of points (small demo)
    INPUT_DIM = 3 + 3 + 1       # PVCNNPVN default input_dim

    key = jax.random.PRNGKey(0)
    kp, kx, kp0, kl, ka, kb = jax.random.split(key, 6)
    params = init_params(kp)

    # uneven mask split (160 points mask==0, 40 points mask==1)
    mask = np.zeros((N,), dtype=np.int32)
    mask[::5] = 1
    na = int((mask == 0).sum())
    nb = int((mask == 1).sum())

    x_input = jax.random.normal(kx, (N, INPUT_DIM), jnp.float32)
    p0 = jax.random.normal(kp0, (N, 3), jnp.float32)
    t = jnp.float32(0.5)
    lan_emd = jax.random.normal(kl, (1, LAN_IN), jnp.float32)
    # stand-ins for p0_encoder outputs (external module, 2049-d features),
    # emitted directly in bf16 (cast at the producer, not per forward call)
    pdf_a = jax.random.normal(ka, (na, PDF_IN), jnp.float32).astype(jnp.bfloat16)
    pdf_b = jax.random.normal(kb, (nb, PDF_IN), jnp.float32).astype(jnp.bfloat16)

    # fused weight / bias built ONCE, in the compute dtype
    proj_consts = prepare_proj_consts(params, lan_emd, compute_dtype=jnp.bfloat16)

    # tile_n=64 for the small demo (exercises multi-step grids + ragged tails on
    # both mask groups); use the default 1024 for production point counts.
    pdf = pvcnn_pvn_forward(x_input, p0, t, mask, lan_emd, pdf_a, pdf_b, params,
                            proj_consts=proj_consts, tile_n=64)
    pdf = jax.block_until_ready(pdf)
    assert pdf.shape == (N, CAT_OUT), pdf.shape
    assert pdf.dtype == jnp.float32, pdf.dtype

    # host-side f32 reference for the implemented branch, using the same
    # bf16-quantized inputs / fused weight (original module semantics)
    idx_a = np.where(mask == 0)[0]
    idx_b = np.where(mask == 1)[0]
    w_pad, bias_row = proj_consts
    w32 = np.asarray(w_pad.astype(jnp.float32))
    b32 = np.asarray(bias_row)
    ref128 = np.zeros((N, OUT_PAD), np.float32)
    ref128[idx_a] = np.asarray(pdf_a.astype(jnp.float32)) @ w32 + b32
    ref128[idx_b] = np.asarray(pdf_b.astype(jnp.float32)) @ w32 + b32
    ref = ref128[:, :CAT_OUT]
    np.testing.assert_allclose(np.asarray(pdf), ref, rtol=1e-3, atol=1e-3)

    print("KERNEL_OK")
</pallas_src>

<mosaic_0001>
module attributes {stable_mosaic.version = 11 : i64} {
  func.func @_pvn_proj_kernel(%arg0: i32, %arg1: memref<64x2049xbf16, #tpu.memory_space<vmem>>, %arg2: memref<2049x128xbf16, #tpu.memory_space<vmem>>, %arg3: memref<1x128xf32, #tpu.memory_space<vmem>>, %arg4: memref<64x128xf32, #tpu.memory_space<vmem>>) attributes {dimension_semantics = [#tpu.dimension_semantics<parallel>], iteration_bounds = array<i64: 3>, scalar_prefetch = 0 : i64, scratch_operands = 0 : i64, tpu.core_type = #tpu.core_type<tc>, window_params = [{transform_indices = @transform_0, window_bounds = array<i64: 64, 2049>}, {pipeline_mode = #tpu.pipeline_mode<synchronous>, transform_indices = @transform_1, window_bounds = array<i64: 2049, 128>}, {pipeline_mode = #tpu.pipeline_mode<synchronous>, transform_indices = @transform_2, window_bounds = array<i64: 1, 128>}, {transform_indices = @transform_3, window_bounds = array<i64: 64, 128>}]} {
    %c0 = arith.constant 0 : index
    %c0_0 = arith.constant 0 : index
    %0 = vector.load %arg1[%c0, %c0_0] : memref<64x2049xbf16, #tpu.memory_space<vmem>>, vector<64x2049xbf16>
    %c0_1 = arith.constant 0 : index
    %c0_2 = arith.constant 0 : index
    %1 = vector.load %arg2[%c0_1, %c0_2] : memref<2049x128xbf16, #tpu.memory_space<vmem>>, vector<2049x128xbf16>
    %cst = arith.constant dense<0.000000e+00> : vector<64x128xf32>
    %2 = tpu.matmul %0, %1, %cst {dimension_numbers = #tpu.dot_dimension_numbers<[1], [0], [0], [1], [0, 0, 1, 1], [], []>} : vector<64x2049xbf16>, vector<2049x128xbf16>, vector<64x128xf32> -> vector<64x128xf32>
    %c0_3 = arith.constant 0 : index
    %c0_4 = arith.constant 0 : index
    %3 = vector.load %arg3[%c0_3, %c0_4] : memref<1x128xf32, #tpu.memory_space<vmem>>, vector<1x128xf32>
    %4 = vector.broadcast %3 : vector<1x128xf32> to vector<64x128xf32>
    %5 = arith.addf %2, %4 : vector<64x128xf32>
    %c0_5 = arith.constant 0 : index
    %c0_6 = arith.constant 0 : index
    %6 = vector.load %arg4[%c0_5, %c0_6] : memref<64x128xf32, #tpu.memory_space<vmem>>, vector<64x128xf32>
    tpu.vector_store %arg4[%c0_5, %c0_6], %5 {strides = array<i32>} : memref<64x128xf32, #tpu.memory_space<vmem>>, vector<64x128xf32>,
    return
  }
  func.func @transform_0(%arg0: i32) -> (i32, i32) {
    %c0_i32 = arith.constant 0 : i32
    %c0_i32_0 = arith.constant 0 : i32
    return %arg0, %c0_i32 : i32, i32
  }
  func.func @transform_1(%arg0: i32) -> (i32, i32) {
    %c0_i32 = arith.constant 0 : i32
    %c0_i32_0 = arith.constant 0 : i32
    %c0_i32_1 = arith.constant 0 : i32
    return %c0_i32, %c0_i32_0 : i32, i32
  }
  func.func @transform_2(%arg0: i32) -> (i32, i32) {
    %c0_i32 = arith.constant 0 : i32
    %c0_i32_0 = arith.constant 0 : i32
    %c0_i32_1 = arith.constant 0 : i32
    return %c0_i32, %c0_i32_0 : i32, i32
  }
  func.func @transform_3(%arg0: i32) -> (i32, i32) {
    %c0_i32 = arith.constant 0 : i32
    %c0_i32_0 = arith.constant 0 : i32
    return %arg0, %c0_i32 : i32, i32
  }
}

</mosaic_0001>

<bundles_post_ra>
// kernel: tpu_custom_call.1
= control target key start
LH: loop header
LB: loop body
LE: loop exit
PB: predicated region body
PF: predicated region fallthrough
CT: control target
= control target key end

     0   :  { %8 = vsyncpa [#allocation3], 0  ;;  %s3717_s0 = inlined_call_operand.hbm [shape: bf16[160,2049], index: 0, kind: input, shape index: {}]   ;;  %s3718_s1 = inlined_call_operand.hbm [shape: bf16[2049,128], index: 1, kind: input, shape index: {}]   ;;  %s3719_s2 = inlined_call_operand.vmem [shape: f32[1,128], index: 2, kind: input, shape index: {}]   ;;  %s3720_s3 = inlined_call_operand.hbm [shape: f32[160,128], index: 3, kind: output, shape index: {}]  }
   0x1   :  { %10 = vsyncpa [#allocation3 + $0x1], 0 }
   0x2   :  { %11 = vsyncpa [#allocation6], 0 }
   0x3   :  { %12 = vsyncpa [#allocation4], 0 }
   0x4   :  { %14 = vsyncpa [#allocation4 + $0x1], 0  ;;  %s3396_s12 = smov 0   ;;  %s3398_s13 = smov 0  }
   0x5   :  { %s3400_s14 = smov 0   ;;  %s3402_s15 = smov 0  }
   0x6 LB: > { %s3417_s16 = sadd.s32 4294967295, %s3364_s15   ;;  %s2386_s17 = sadd.s32 4294967294, %s3364_s15   ;;  %s3364_s15 = sphi %s3402_s15, %s3740_s15   ;;  %s3360_s14 = sphi %s3400_s14, %s3739_s14   ;;  %s3356_s13 = sphi %s3398_s13, %s3738_s13   ;;  %s3352_s12 = sphi %s3396_s12, %s3737_s12  }
   0x7   : > { %s3421_s18 = sadd.s32 1, %s3364_s15   ;;  %s27_s19 = sadd.s32 1, %s3360_s14 }
   0x8   : > { %s24_s20 = ssub.s32 %s3364_s15, %s3421_s18  ;;  %p34_p0 = scmp.ne.s32.totalorder %s3360_s14, %s3356_s13 }
   0x9   : > { %p25_p1 = scmp.eq.s32.totalorder %s24_s20, 0  ;;  %p35_p2 = scmp.eq.s32.totalorder %s3364_s15, 0 }
   0xa   : > { %p40_p3 = scmp.ne.s32.totalorder %s3356_s13, %s3352_s12  ;;  %p3721_p4 = scmp.eq.s32.totalorder %s3417_s16, 0 }
   0xb   : > { %s3433_s21 = scalar_select %p25_p1, %s3360_s14, %s27_s19  }
   0xc   : > { %p3435_p5 = por %p35_p2, %p34_p0  ;;  %p3441_p6 = por %p3721_p4, %p40_p3 }
   0xd   : > { %p106_p7 = scmp.eq.s32.totalorder %s3417_s16, 2  ;;  %p112_p8 = scmp.eq.s32.totalorder %s2386_s17, 2 }
   0xe   : > { %s3724_s22 = scalar_select %p3435_p5, 1, 0 }
   0xf   : > { %s3725_s23 = scalar_select %p3441_p6, 1, 0 }
  0x10   : > { %p2387_p9 = scmp.ge.s32.totalorder %s3364_s15, 1  ;;  %p119_p10 = scmp.lt.s32.totalorder %s3364_s15, 4 }
  0x11   : > { %p3448_p11 = por %p106_p7, %p34_p0  ;;  %p3452_p12 = por %p112_p8, %p40_p3 }
  0x12   : > { %p3456_p13 = pnand %p2387_p9, %p119_p10  ;;  %s3366_s27 = smov [#allocation5]  }
  0x13   : > { %s3726_s24 = scalar_select %p3448_p11, 1, 0 }
  0x14   : > { %s3727_s25 = scalar_select %p3452_p12, 1, 0 }
  0x15   : > { %s3728_s26 = scalar_select %p3456_p13, 1, 0 }
  0x16   : > { %p2958_p1 = pneg %p3456_p13  ;;  %s131_s28 = sshll.u32 %s3366_s27, 4  ;;  %s132_s28 = int_to_ptr.vmem [resolvable:$true] %s131_s28 }
  0x17   : > { %s3238_s5 = scalar_lea.hbm %s3718_s1, 16448 }
  0x18   : > { %p3464_p2 = pnand %p2958_p1, %p3721_p4  ;;  %p3239_p0 = scmp.ne.s32.totalorder %s3718_s1, %s3238_s5 }
  0x19   : > { %p3245_p9 = scmp.lt.u32.totalorder %s3238_s5, %s3718_s1 }
  0x1a   : > { %p3240_p3 = pneg %p3464_p2 }
  0x1c   : > { %p3241_p7 = pnand %p3240_p3, %p3239_p0 }
  0x1e   : > { %p3242_p8 = pneg %p3241_p7 }
  0x20   : > { %p3247_p10 = pnand %p3245_p9, %p3242_p8 }
  0x22   : > { %3250 = shalt.err (!%p3247_p10)
}
  0x23   : > { %s3251_s10 = scalar_lea.vmem %s132_s28, 16448  ;;  %p3259_p11 = scmp.lt.s32.totalorder %s132_s28, %s132_s28 }
  0x24   : > { %p3252_p1 = scmp.ne.s32.totalorder %s132_s28, %s3251_s10  ;;  %p3260_p6 = scmp.lt.s32.totalorder %s3251_s10, %s3251_s10 }
  0x26   : > { %p3254_p4 = pnand %p3252_p1, %p3240_p3  ;;  %p3261_p13 = por %p3260_p6, %p3259_p11 }
  0x28   : > { %p3255_p12 = pneg %p3254_p4 }
  0x2a   : > { %p3262_p5 = pnand %p3261_p13, %p3255_p12 }
  0x2c   : > { %3265 = shalt.err (!%p3262_p5)
}
  0x2d   : > { %s3367_s11 = smov 64   ;;  %s3368_s17 = smov 4  }
  0x2e   : > { %2961 = dma.hbm_to_vmem [thread:$0]  (!%p3464_p2), %s3718_s1, 16448, %s132_s28, [#allocation6], %s3367_s11, %s3367_s11, %s3368_s17  }
  0x2f   : > { %p2389_p0 = scmp.ge.s32.totalorder %s3364_s15, 3 }
  0x30   : > { %p3730_p7 = scmp.ne.s32.totalorder (!%p2389_p0), %s3724_s22, 0 }
  0x31   : > { %144 = sbr.rel (%p2389_p0) target bundleno = 92 (0x5c), region = 24 }
  0x38   : > { %147 = sbr.rel (!%p3730_p7) target bundleno = 92 (0x5c), region = 28  ;;  %s148_s27 = sand.u32 (%p3730_p7), 1, %s3360_s14  }
  0x39   : > { %s2390_s30 = sshll.u32 (%p3730_p7), %s3364_s15, 3  ;;  %s2949_s4 = smul.u32 (%p3730_p7), 544, %s148_s27 }
  0x3a   : > { %s154_s5 = ssub.s32 (%p3730_p7), 20, %s2390_s30  ;;  %s3492_s7 = scalar_lea.sflag (%p3730_p7), [#allocation3], %s148_s27 }
  0x3b   : > { %p155_p4 = scmp.lt.s32.totalorder (%p3730_p7), %s154_s5, 8  ;;  %s152_s28 = scalar_lea.vmem (%p3730_p7), [#allocation2], %s2949_s4 }
  0x3f   : > { %s3742_s5 = smov (!%p155_p4, %s154_s5), 8 }
  0x40   : > { %s3489_s6 = smul.u32 1088, %s3742_s5 }
  0x42   : > { %s160_s29 = ssub.s32 8704, %s3489_s6 }
  0x43   : > { %161 = vsyncadd %s3492_s7, %s160_s29  ;;  %p2393_p5 = scmp.ne.s32.totalorder %s3489_s6, 0  ;;  %s2950_s22 = smul.u32 8704, %s3364_s15 }
  0x44   : > { %s167_s8 = sshll.u32 %s152_s28, 4  ;;  %s3270_s27 = scalar_lea.hbm %s3717_s0, 21760  ;;  %s3502_s8 = int_to_ptr.vmem [resolvable:$true] %s167_s8 }
  0x45   : > { %s3500_s11 = scalar_lea.hbm %s3717_s0, %s2950_s22 }
  0x46   : > { %s3266_s17 = scalar_lea.hbm %s3500_s11, %s3489_s6  ;;  %p3271_p13 = scmp.lt.u32.totalorder %s3500_s11, %s3717_s0 }
  0x47   : > { %p3267_p6 = scmp.ne.s32.totalorder %s3500_s11, %s3266_s17  ;;  %p3272_p2 = scmp.lt.u32.totalorder %s3270_s27, %s3266_s17 }
  0x48   : > { %p3274_p8 = scmp.lt.u32.totalorder %s3266_s17, %s3500_s11 }
  0x49   : > { %p3268_p11 = pnand %p3267_p6, %p2393_p5  ;;  %p3273_p3 = por %p3272_p2, %p3271_p13 }
  0x4b   : > { %p3269_p12 = pneg %p3268_p11  ;;  %p3275_p9 = por %p3274_p8, %p3273_p3 }
  0x4d   : > { %p3276_p10 = pnand %p3275_p9, %p3269_p12 }
  0x4f   : > { %3279 = shalt.err (!%p3276_p10)
}
  0x50   : > { %s3280_s5 = scalar_lea.vmem %s3502_s8, %s3489_s6  ;;  %s3369_s29 = smov [#allocation2]  }
  0x51   : > { %p3281_p1 = scmp.ne.s32.totalorder %s3502_s8, %s3280_s5  ;;  %s3284_s28 = sshll.u32 %s3369_s29, 4  ;;  %s3285_s28 = int_to_ptr.vmem [resolvable:$false] %s3284_s28 }
  0x52   : > { %s3286_s22 = scalar_lea.vmem %s3285_s28, 17408  ;;  %p3287_p4 = scmp.lt.s32.totalorder %s3502_s8, %s3285_s28 }
  0x53   : > { %p3282_p0 = pnand %p3281_p1, %p2393_p5  ;;  %p3288_p6 = scmp.lt.s32.totalorder %s3286_s22, %s3280_s5 }
  0x55   : > { %p3283_p7 = pneg %p3282_p0  ;;  %p3289_p11 = por %p3288_p6, %p3287_p4 }
  0x57   : > { %p3290_p13 = pnand %p3289_p11, %p3283_p7 }
  0x59   : > { %3293 = shalt.err (!%p3290_p13)
}
  0x5a   : > { %s3370_s9 = smov 1088   ;;  %s3371_s10 = smov 68  }
  0x5b   : > { %173 = dma.hbm_to_vmem [thread:$0]  (%p2393_p5), %s3500_s11, %s3489_s6, %s3502_s8, %s3492_s7, %s3370_s9, %s3370_s9, %s3371_s10  }
  0x5c PF: > { %p3731_p12 = scmp.ne.s32.totalorder %s3728_s26, 0 }
  0x5d   : > { %s3532_s17 = sand.u32 (!%p3731_p12), 1, %s3356_s13   ;;  %p3732_p2 = scmp.ne.s32.totalorder (!%p3731_p12), %s3725_s23, 0 }
  0x5e   : > { %179 = sbr.rel (%p3731_p12) target bundleno = 514 (0x202), region = 32  ;;  %s182_s20 = scalar_lea.sflag (!%p3731_p12), [#allocation3], %s3532_s17 }
  0x5f   : > { %s2951_s19 = smul.u32 (!%p3731_p12), 544, %s3532_s17 }
  0x61   : > { %s3536_s27 = scalar_lea.vmem (!%p3731_p12), [#allocation2], %s2951_s19 }
  0x65   : > { %3339 = dma.done.wait (%p3732_p2), %s182_s20, 8704  }
  0x66   : > { %3341 = vsyncadd (%p3732_p2), %s182_s20, 4294958592  ;;  %p3733_p5 = scmp.eq.s32.totalorder %s3417_s16, 0 }
  0x68   : > { %3343 = dma.done.wait (%p3733_p5), [#allocation6], 16448   ;;  %p3734_p3 = pmov %p3733_p5 }
  0x69   : > { %v3009_v0 = vld [vmem:[#allocation5 + $0x40] sm:$0xff]   ;;  %v3013_v4 = vld [vmem:[#allocation5 + $0x48] sm:$0xff]   ;;  %v3017_v8 = vld [vmem:[#allocation5 + $0x50] sm:$0xff]   ;;  %vm1684_vm0 = vcmask 1040384   ;;  %vm1671_vm1 = vcmask 7168   ;;  %s2399_s6 = sshll.u32 %s3532_s17, 6 }
  0x6a   : > { %3345 = vsyncadd (%p3734_p3), [#allocation6], 4294950848  ;;  %v3010_v1 = vld [vmem:[#allocation5 + $0xc0] sm:$0xff]   ;;  %2612 = vmatprep.subr.bf16.mxu0 %v3009_v0  ;;  %v3014_v5 = vld [vmem:[#allocation5 + $0xc8] sm:$0xff]   ;;  %s3644_s7 = scalar_lea.vmem [#allocation7], %s2399_s6  ;;  %s2284_s8 = scalar_lea.sflag [#allocation4], %s3532_s17 }
  0x6b   : > { %v3011_v2 = vld [vmem:[#allocation5] sm:$0xff]   ;;  %2652 = vmatprep.subr.bf16.mxu1 %v3010_v1  ;;  %v3015_v6 = vld [vmem:[#allocation5 + $0x8] sm:$0xff]   ;;  %v3018_v9 = vld [vmem:[#allocation5 + $0xd0] sm:$0xff]   ;;  %p3735_p8 = scmp.ne.s32.totalorder %s3726_s24, 0 }
  0x6c   : > { %v3012_v3 = vld [vmem:[#allocation5 + $0x80] sm:$0xff]   ;;  %2613 = vmatpush3.bf16.msra.mxu0 %v3011_v2  ;;  %v3016_v7 = vld [vmem:[#allocation5 + $0x88] sm:$0xff]   ;;  %v3019_v10 = vld [vmem:[#allocation5 + $0x10] sm:$0xff]   ;;  %s2603_s11 = sshll.u32 (%p3735_p8), %s3417_s16, 3 }
  0x6d   : > { %2653 = vmatpush3.bf16.msra.mxu1 %v3012_v3  ;;  %2614 = vmatprep.subr.bf16.mxu0 %v3013_v4  ;;  %v3020_v11 = vld [vmem:[#allocation5 + $0x90] sm:$0xff]   ;;  %v3021_v12 = vld [vmem:[#allocation5 + $0x58] sm:$0xff]   ;;  %v3025_v16 = vld [vmem:[#allocation5 + $0x60] sm:$0xff]   ;;  %s2292_s30 = ssub.s32 (%p3735_p8), 20, %s2603_s11 }
  0x6e   : > { %2654 = vmatprep.subr.bf16.mxu1 %v3014_v5  ;;  %v3022_v13 = vld [vmem:[#allocation5 + $0xd8] sm:$0xff]   ;;  %v3026_v17 = vld [vmem:[#allocation5 + $0xe0] sm:$0xff]   ;;  %v3029_v20 = vld [vmem:[#allocation5 + $0x68] sm:$0xff]   ;;  %p2293_p9 = scmp.lt.s32.totalorder (%p3735_p8), %s2292_s30, 8 }
  0x6f   : > { %v3023_v14 = vld [vmem:[#allocation5 + $0x18] sm:$0xff]   ;;  %v3027_v18 = vld [vmem:[#allocation5 + $0x20] sm:$0xff]   ;;  %v3030_v21 = vld [vmem:[#allocation5 + $0xe8] sm:$0xff]  }
  0x70   : > { %2615 = vmatpush3.bf16.msra.mxu0 %v3015_v6  ;;  %v3024_v15 = vld [vmem:[#allocation5 + $0x98] sm:$0xff]   ;;  %v3028_v19 = vld [vmem:[#allocation5 + $0xa0] sm:$0xff]   ;;  %v3031_v22 = vld [vmem:[#allocation5 + $0x28] sm:$0xff]  }
  0x71   : > { %2655 = vmatpush3.bf16.msra.mxu1 %v3016_v7  ;;  %2616 = vmatprep.subr.bf16.mxu0 %v3017_v8  ;;  %v3032_v23 = vld [vmem:[#allocation5 + $0xa8] sm:$0xff]   ;;  %v3033_v24 = vld [vmem:[#allocation5 + $0x70] sm:$0xff]   ;;  %v3037_v28 = vld [vmem:[#allocation5 + $0x78] sm:$0xff]  }
  0x72   : > { %2656 = vmatprep.subr.bf16.mxu1 %v3018_v9  ;;  %v3034_v25 = vld [vmem:[#allocation5 + $0xf0] sm:$0xff]   ;;  %v3038_v29 = vld [vmem:[#allocation5 + $0xf8] sm:$0xff]   ;;  %v3041_v32 = vld [vmem:[%s3536_s27] ss:$68 sps:$4 sm:$0xff]  }
  0x73   : > { %v3035_v26 = vld [vmem:[#allocation5 + $0x30] sm:$0xff]   ;;  %v3039_v30 = vld [vmem:[#allocation5 + $0x38] sm:$0xff]   ;;  %v3043_v33 = vld [vmem:[%s3536_s27 + $0x4] ss:$68 sps:$4 sm:$0xff]  }
  0x74   : > { %2617 = vmatpush3.bf16.msra.mxu0 %v3019_v10  ;;  %v3036_v27 = vld [vmem:[#allocation5 + $0xb0] sm:$0xff]   ;;  %v3040_v31 = vld [vmem:[#allocation5 + $0xb8] sm:$0xff]   ;;  %v3044_v34 = vld [vmem:[%s3536_s27 + $0x8] ss:$68 sps:$4 sm:$0xff]   ;;  %1722 = vmatprep.mubr.bf16.mxu0 %v3043_v33 }
  0x75   : > { %2657 = vmatpush3.bf16.msra.mxu1 %v3020_v11  ;;  %2618 = vmatprep.subr.bf16.mxu0 %v3021_v12  ;;  %v3046_v35 = vld [vmem:[%s3536_s27 + $0xc] ss:$68 sps:$4 sm:$0xff]   ;;  %v3047_v36 = vld [vmem:[#allocation5 + $0x140] sm:$0xff]   ;;  %v3057_v45 = vld [vmem:[%s3536_s27 + $0x94] ss:$68 sps:$4 sm:$0xff]  }
  0x76   : > { %2658 = vmatprep.subr.bf16.mxu1 %v3022_v13  ;;  %1787 = vmatprep.mubr.bf16.mxu1 %v3046_v35  ;;  %v3048_v37 = vld [vmem:[#allocation5 + $0x1c0] sm:$0xff]   ;;  %v3051_v40 = vld [vmem:[#allocation5 + $0x148] sm:$0xff]   ;;  %v3060_v47 = vld [vmem:[%s3536_s27 + $0x90] ss:$68 sps:$4 sm:$0xff]  }
  0x77   : > { %v3049_v38 = vld [vmem:[#allocation5 + $0x100] sm:$0xff]   ;;  %v3052_v41 = vld [vmem:[#allocation5 + $0x1c8] sm:$0xff]   ;;  %v3061_v48 = vld [vmem:[#allocation5 + $0x150] sm:$0xff]  }
  0x78   : > { %2619 = vmatpush3.bf16.msra.mxu0 %v3023_v14  ;;  %v3050_v39 = vld [vmem:[#allocation5 + $0x180] sm:$0xff]   ;;  %v3053_v42 = vld [vmem:[#allocation5 + $0x108] sm:$0xff]   ;;  %v3062_v49 = vld [vmem:[#allocation5 + $0x1d0] sm:$0xff]  }
  0x79   : > { %2659 = vmatpush3.bf16.msra.mxu1 %v3024_v15  ;;  %2620 = vmatprep.subr.bf16.mxu0 %v3025_v16  ;;  %v3054_v43 = vld [vmem:[#allocation5 + $0x188] sm:$0xff]   ;;  %v3063_v50 = vld [vmem:[#allocation5 + $0x110] sm:$0xff]   ;;  %v3065_v52 = vld [vmem:[#allocation5 + $0x158] sm:$0xff]  }
  0x7a   : > { %2660 = vmatprep.subr.bf16.mxu1 %v3026_v17  ;;  %v3055_v44 = vld [vmem:[%s3536_s27 + $0x8c] ss:$68 sps:$4 sm:$0xff]   ;;  %v3066_v53 = vld [vmem:[#allocation5 + $0x1d8] sm:$0xff]   ;;  %v3075_v60 = vld [vmem:[#allocation5 + $0x160] sm:$0xff]  }
  0x7b   : > { %v3059_v46 = vld [vmem:[%s3536_s27 + $0x88] ss:$68 sps:$4 sm:$0xff]   ;;  %v3064_v51 = vld [vmem:[#allocation5 + $0x190] sm:$0xff]   ;;  %v3067_v54 = vld [vmem:[#allocation5 + $0x118] sm:$0xff]  }
  0x7c   : > { %2621 = vmatpush3.bf16.msra.mxu0 %v3027_v18  ;;  %v3068_v55 = vld [vmem:[#allocation5 + $0x198] sm:$0xff]   ;;  %v3073_v58 = vld [vmem:[%s3536_s27 + $0x110] ss:$68 sps:$4 sm:$0xff]   ;;  %v3076_v61 = vld [vmem:[#allocation5 + $0x1e0] sm:$0xff]  }
  0x7d   : > { %2661 = vmatpush3.bf16.msra.mxu1 %v3028_v19  ;;  %2622 = vmatprep.subr.bf16.mxu0 %v3029_v20  ;;  %v3069_v56 = vld [vmem:[%s3536_s27 + $0x114] ss:$68 sps:$4 sm:$0xff]   ;;  %v3071_v57 = vld [vmem:[%s3536_s27 + $0x11c] ss:$68 sps:$4 sm:$0xff]   ;;  %v3079_v0 = vld [vmem:[#allocation5 + $0x168] sm:$0xff]  }
  0x7e   : > { %2662 = vmatprep.subr.bf16.mxu1 %v3030_v21  ;;  %v3074_v59 = vld [vmem:[%s3536_s27 + $0x118] ss:$68 sps:$4 sm:$0xff]   ;;  %v3077_v62 = vld [vmem:[#allocation5 + $0x120] sm:$0xff]   ;;  %v3080_v1 = vld [vmem:[#allocation5 + $0x1e8] sm:$0xff]  }
  0x7f   : > { %v3078_v63 = vld [vmem:[#allocation5 + $0x1a0] sm:$0xff]   ;;  %v3081_v2 = vld [vmem:[#allocation5 + $0x128] sm:$0xff]   ;;  %v3087_v6 = vld [vmem:[%s3536_s27 + $0x198] ss:$68 sps:$4 sm:$0xff]  }
  0x80   : > { %2623 = vmatpush3.bf16.msra.mxu0 %v3031_v22  ;;  %v3082_v3 = vld [vmem:[#allocation5 + $0x1a8] sm:$0xff]   ;;  %v3083_v4 = vld [vmem:[%s3536_s27 + $0x19c] ss:$68 sps:$4 sm:$0xff]   ;;  %v3089_v8 = vld [vmem:[#allocation5 + $0x170] sm:$0xff]  }
  0x81   : > { %2663 = vmatpush3.bf16.msra.mxu1 %v3032_v23  ;;  %2624 = vmatprep.subr.bf16.mxu0 %v3033_v24  ;;  %v3085_v5 = vld [vmem:[%s3536_s27 + $0x1a4] ss:$68 sps:$4 sm:$0xff]   ;;  %v3090_v9 = vld [vmem:[#allocation5 + $0x1f0] sm:$0xff]   ;;  %v3093_v12 = vld [vmem:[#allocation5 + $0x178] sm:$0xff]  }
  0x82   : > { %2664 = vmatprep.subr.bf16.mxu1 %v3034_v25  ;;  %v3088_v7 = vld [vmem:[%s3536_s27 + $0x1a0] ss:$68 sps:$4 sm:$0xff]   ;;  %v3091_v10 = vld [vmem:[#allocation5 + $0x130] sm:$0xff]   ;;  %v3094_v13 = vld [vmem:[#allocation5 + $0x1f8] sm:$0xff]  }
  0x83   : > { %v3092_v11 = vld [vmem:[#allocation5 + $0x1b0] sm:$0xff]   ;;  %v3095_v14 = vld [vmem:[#allocation5 + $0x138] sm:$0xff]   ;;  %v3103_v20 = vld [vmem:[#allocation5 + $0x240] sm:$0xff]  }
  0x84   : > { %2625 = vmatpush3.bf16.msra.mxu0 %v3035_v26  ;;  %v3096_v15 = vld [vmem:[#allocation5 + $0x1b8] sm:$0xff]   ;;  %v3097_v16 = vld [vmem:[%s3536_s27 + $0x10] ss:$68 sps:$4 sm:$0xff]   ;;  %v3104_v21 = vld [vmem:[#allocation5 + $0x2c0] sm:$0xff]  }
  0x85   : > { %2665 = vmatpush3.bf16.msra.mxu1 %v3036_v27  ;;  %2626 = vmatprep.subr.bf16.mxu0 %v3037_v28  ;;  %v3099_v17 = vld [vmem:[%s3536_s27 + $0x14] ss:$68 sps:$4 sm:$0xff]   ;;  %v3102_v19 = vld [vmem:[%s3536_s27 + $0x1c] ss:$68 sps:$4 sm:$0xff]   ;;  %v3107_v24 = vld [vmem:[#allocation5 + $0x248] sm:$0xff]  }
  0x86   : > { %2666 = vmatprep.subr.bf16.mxu1 %v3038_v29  ;;  %v3100_v18 = vld [vmem:[%s3536_s27 + $0x18] ss:$68 sps:$4 sm:$0xff]   ;;  %v3105_v22 = vld [vmem:[#allocation5 + $0x200] sm:$0xff]   ;;  %v3108_v25 = vld [vmem:[#allocation5 + $0x2c8] sm:$0xff]  }
  0x87   : > { %v3106_v23 = vld [vmem:[#allocation5 + $0x280] sm:$0xff]   ;;  %v3109_v26 = vld [vmem:[#allocation5 + $0x208] sm:$0xff]   ;;  %v3118_v33 = vld [vmem:[#allocation5 + $0x2d0] sm:$0xff]  }
  0x88   : > { %2627 = vmatpush3.bf16.msra.mxu0 %v3039_v30  ;;  %v3110_v27 = vld [vmem:[#allocation5 + $0x288] sm:$0xff]   ;;  %v3111_v28 = vld [vmem:[%s3536_s27 + $0x9c] ss:$68 sps:$4 sm:$0xff]   ;;  %v3120_v35 = vld [vmem:[#allocation5 + $0x290] sm:$0xff]  }
  0x89   : > { %2667 = vmatpush3.bf16.msra.mxu1 %v3040_v31  ;;  %2692 = vmatprep.subr.bf16.mxu0 %v3047_v36  ;;  %v3113_v29 = vld [vmem:[%s3536_s27 + $0xa4] ss:$68 sps:$4 sm:$0xff]   ;;  %v3115_v30 = vld [vmem:[%s3536_s27 + $0x98] ss:$68 sps:$4 sm:$0xff]  }
  0x8a   : > { %2732 = vmatprep.subr.bf16.mxu1 %v3048_v37  ;;  %v3116_v31 = vld [vmem:[%s3536_s27 + $0xa0] ss:$68 sps:$4 sm:$0xff]   ;;  %v3121_v36 = vld [vmem:[#allocation5 + $0x258] sm:$0xff]  }
  0x8b   : > { %1723 = vmatmul.mubr.bf16.vlgmr.msra.gmra.mrb[0].mxu0 %v3041_v32  ;;  %v3117_v32 = vld [vmem:[#allocation5 + $0x250] sm:$0xff]   ;;  %v3122_v37 = vld [vmem:[#allocation5 + $0x2d8] sm:$0xff]  }
  0x8c   : > { %1788 = vmatmul.mubr.bf16.vlgmr.msra.gmra.mrb[0].mxu1 %v3044_v34  ;;  %2693 = vmatpush3.bf16.msra.mxu0 %v3049_v38  ;;  %v3119_v34 = vld [vmem:[#allocation5 + $0x210] sm:$0xff]   ;;  %v3123_v38 = vld [vmem:[#allocation5 + $0x218] sm:$0xff]  }
  0x8d   : > { %2733 = vmatpush3.bf16.msra.mxu1 %v3050_v39  ;;  %2694 = vmatprep.subr.bf16.mxu0 %v3051_v40  ;;  %v3124_v39 = vld [vmem:[#allocation5 + $0x298] sm:$0xff]   ;;  %v3125_v40 = vld [vmem:[%s3536_s27 + $0x124] ss:$68 sps:$4 sm:$0xff]  }
  0x8e   : > { %2734 = vmatprep.subr.bf16.mxu1 %v3052_v41  ;;  %1730 = vmatprep.mubr.bf16.mxu0 %v3055_v44  ;;  %v3127_v41 = vld [vmem:[%s3536_s27 + $0x12c] ss:$68 sps:$4 sm:$0xff]   ;;  %v3131_v44 = vld [vmem:[#allocation5 + $0x260] sm:$0xff]  }
  0x8f   : > { %1795 = vmatprep.mubr.bf16.mxu1 %v3057_v45  ;;  %v3132_v45 = vld [vmem:[#allocation5 + $0x2e0] sm:$0xff]  }
  0x90   : > { %2695 = vmatpush3.bf16.msra.mxu0 %v3053_v42  ;;  %v3129_v42 = vld [vmem:[%s3536_s27 + $0x120] ss:$68 sps:$4 sm:$0xff]  }
  0x91   : > { %2735 = vmatpush3.bf16.msra.mxu1 %v3054_v43  ;;  %2696 = vmatprep.subr.bf16.mxu0 %v3061_v48  ;;  %v3130_v43 = vld [vmem:[%s3536_s27 + $0x128] ss:$68 sps:$4 sm:$0xff]  }
  0x92   : > { %2736 = vmatprep.subr.bf16.mxu1 %v3062_v49  ;;  %v3135_v48 = vld [vmem:[#allocation5 + $0x268] sm:$0xff]  }
  0x93   : > { %1731 = vmatmul.mubr.bf16.gmra.mrb[4].mxu0 %v3059_v46  ;;  %v3133_v46 = vld [vmem:[#allocation5 + $0x220] sm:$0xff]   ;;  %v3136_v49 = vld [vmem:[#allocation5 + $0x2e8] sm:$0xff]  }
  0x94   : > { %1796 = vmatmul.mubr.bf16.gmra.mrb[4].mxu1 %v3060_v47  ;;  %2697 = vmatpush3.bf16.msra.mxu0 %v3063_v50  ;;  %v3134_v47 = vld [vmem:[#allocation5 + $0x2a0] sm:$0xff]   ;;  %v3137_v50 = vld [vmem:[#allocation5 + $0x228] sm:$0xff]  }
  0x95   : > { %2737 = vmatpush3.bf16.msra.mxu1 %v3064_v51  ;;  %2698 = vmatprep.subr.bf16.mxu0 %v3065_v52  ;;  %v3138_v51 = vld [vmem:[#allocation5 + $0x2a8] sm:$0xff]  }
  0x96   : > { %2738 = vmatprep.subr.bf16.mxu1 %v3066_v53  ;;  %1738 = vmatprep.mubr.bf16.mxu0 %v3069_v56  ;;  %v3139_v52 = vld [vmem:[%s3536_s27 + $0x1ac] ss:$68 sps:$4 sm:$0xff]   ;;  %v3141_v53 = vld [vmem:[%s3536_s27 + $0x1b4] ss:$68 sps:$4 sm:$0xff]  }
  0x97   : > { %1803 = vmatprep.mubr.bf16.mxu1 %v3071_v57  ;;  %v3145_v56 = vld [vmem:[#allocation5 + $0x270] sm:$0xff]  }
  0x98   : > { %2699 = vmatpush3.bf16.msra.mxu0 %v3067_v54  ;;  %v3143_v54 = vld [vmem:[%s3536_s27 + $0x1a8] ss:$68 sps:$4 sm:$0xff]   ;;  %v3146_v57 = vld [vmem:[#allocation5 + $0x2f0] sm:$0xff]  }
  0x99   : > { %2739 = vmatpush3.bf16.msra.mxu1 %v3068_v55  ;;  %2700 = vmatprep.subr.bf16.mxu0 %v3075_v60  ;;  %v3144_v55 = vld [vmem:[%s3536_s27 + $0x1b0] ss:$68 sps:$4 sm:$0xff]   ;;  %v3149_v60 = vld [vmem:[#allocation5 + $0x278] sm:$0xff]  }
  0x9a   : > { %2740 = vmatprep.subr.bf16.mxu1 %v3076_v61  ;;  %v3150_v61 = vld [vmem:[#allocation5 + $0x2f8] sm:$0xff]  }
  0x9b   : > { %1739 = vmatmul.mubr.bf16.gmra.mrb[8].mxu0 %v3073_v58  ;;  %v3147_v58 = vld [vmem:[#allocation5 + $0x230] sm:$0xff]  }
  0x9c   : > { %1804 = vmatmul.mubr.bf16.gmra.mrb[8].mxu1 %v3074_v59  ;;  %2701 = vmatpush3.bf16.msra.mxu0 %v3077_v62  ;;  %v3148_v59 = vld [vmem:[#allocation5 + $0x2b0] sm:$0xff]   ;;  %v3151_v62 = vld [vmem:[#allocation5 + $0x238] sm:$0xff]  }
  0x9d   : > { %2741 = vmatpush3.bf16.msra.mxu1 %v3078_v63  ;;  %2702 = vmatprep.subr.bf16.mxu0 %v3079_v0  ;;  %v3152_v63 = vld [vmem:[#allocation5 + $0x2b8] sm:$0xff]   ;;  %v3153_v0 = vld [vmem:[%s3536_s27 + $0x20] ss:$68 sps:$4 sm:$0xff]  }
  0x9e   : > { %2742 = vmatprep.subr.bf16.mxu1 %v3080_v1  ;;  %1746 = vmatprep.mubr.bf16.mxu0 %v3083_v4  ;;  %v3155_v1 = vld [vmem:[%s3536_s27 + $0x24] ss:$68 sps:$4 sm:$0xff]  }
  0x9f   : > { %1811 = vmatprep.mubr.bf16.mxu1 %v3085_v5  ;;  %v3159_v4 = vld [vmem:[#allocation5 + $0x340] sm:$0xff]  }
  0xa0   : > { %2703 = vmatpush3.bf16.msra.mxu0 %v3081_v2  ;;  %v3156_v2 = vld [vmem:[%s3536_s27 + $0x28] ss:$68 sps:$4 sm:$0xff]   ;;  %v3160_v5 = vld [vmem:[#allocation5 + $0x3c0] sm:$0xff]  }
  0xa1   : > { %2743 = vmatpush3.bf16.msra.mxu1 %v3082_v3  ;;  %2704 = vmatprep.subr.bf16.mxu0 %v3089_v8  ;;  %v3158_v3 = vld [vmem:[%s3536_s27 + $0x2c] ss:$68 sps:$4 sm:$0xff]  }
  0xa2   : > { %2744 = vmatprep.subr.bf16.mxu1 %v3090_v9  ;;  %v3163_v8 = vld [vmem:[#allocation5 + $0x348] sm:$0xff]  }
  0xa3   : > { %1747 = vmatmul.mubr.bf16.gmra.mrb[12].mxu0 %v3087_v6  ;;  %v3161_v6 = vld [vmem:[#allocation5 + $0x300] sm:$0xff]   ;;  %v3164_v9 = vld [vmem:[#allocation5 + $0x3c8] sm:$0xff]  }
  0xa4   : > { %1812 = vmatmul.mubr.bf16.gmra.mrb[12].mxu1 %v3088_v7  ;;  %2705 = vmatpush3.bf16.msra.mxu0 %v3091_v10  ;;  %v3162_v7 = vld [vmem:[#allocation5 + $0x380] sm:$0xff]   ;;  %v3165_v10 = vld [vmem:[#allocation5 + $0x308] sm:$0xff]  }
  0xa5   : > { %2745 = vmatpush3.bf16.msra.mxu1 %v3092_v11  ;;  %2706 = vmatprep.subr.bf16.mxu0 %v3093_v12  ;;  %v3166_v11 = vld [vmem:[#allocation5 + $0x388] sm:$0xff]  }
  0xa6   : > { %2746 = vmatprep.subr.bf16.mxu1 %v3094_v13  ;;  %1852 = vmatprep.mubr.bf16.mxu0 %v3099_v17  ;;  %v3167_v12 = vld [vmem:[%s3536_s27 + $0xac] ss:$68 sps:$4 sm:$0xff]   ;;  %v3169_v13 = vld [vmem:[%s3536_s27 + $0xb4] ss:$68 sps:$4 sm:$0xff]  }
  0xa7   : > { %1917 = vmatprep.mubr.bf16.mxu1 %v3102_v19  ;;  %v3174_v17 = vld [vmem:[#allocation5 + $0x3d0] sm:$0xff]  }
  0xa8   : > { %2707 = vmatpush3.bf16.msra.mxu0 %v3095_v14  ;;  %v3171_v14 = vld [vmem:[%s3536_s27 + $0xa8] ss:$68 sps:$4 sm:$0xff]   ;;  %v3176_v19 = vld [vmem:[#allocation5 + $0x390] sm:$0xff]  }
  0xa9   : > { %2747 = vmatpush3.bf16.msra.mxu1 %v3096_v15  ;;  %2772 = vmatprep.subr.bf16.mxu0 %v3103_v20  ;;  %v3172_v15 = vld [vmem:[%s3536_s27 + $0xb0] ss:$68 sps:$4 sm:$0xff]   ;;  %v3177_v20 = vld [vmem:[#allocation5 + $0x358] sm:$0xff]  }
  0xaa   : > { %2812 = vmatprep.subr.bf16.mxu1 %v3104_v21  ;;  %v3178_v21 = vld [vmem:[#allocation5 + $0x3d8] sm:$0xff]  }
  0xab   : > { %1853 = vmatmul.mubr.bf16.vlgmr.msra.gmra.mrb[16].mxu0 %v3097_v16  ;;  %v3173_v16 = vld [vmem:[#allocation5 + $0x350] sm:$0xff]  }
  0xac   : > { %1918 = vmatmul.mubr.bf16.vlgmr.msra.gmra.mrb[16].mxu1 %v3100_v18  ;;  %2773 = vmatpush3.bf16.msra.mxu0 %v3105_v22  ;;  %v3175_v18 = vld [vmem:[#allocation5 + $0x310] sm:$0xff]   ;;  %v3179_v22 = vld [vmem:[#allocation5 + $0x318] sm:$0xff]  }
  0xad   : > { %2813 = vmatpush3.bf16.msra.mxu1 %v3106_v23  ;;  %2774 = vmatprep.subr.bf16.mxu0 %v3107_v24  ;;  %v3180_v23 = vld [vmem:[#allocation5 + $0x398] sm:$0xff]  }
  0xae   : > { %2814 = vmatprep.subr.bf16.mxu1 %v3108_v25  ;;  %1860 = vmatprep.mubr.bf16.mxu0 %v3111_v28  ;;  %v3181_v24 = vld [vmem:[%s3536_s27 + $0x134] ss:$68 sps:$4 sm:$0xff]   ;;  %v3183_v25 = vld [vmem:[%s3536_s27 + $0x13c] ss:$68 sps:$4 sm:$0xff]  }
  0xaf   : > { %1925 = vmatprep.mubr.bf16.mxu1 %v3113_v29  ;;  %v3187_v28 = vld [vmem:[#allocation5 + $0x360] sm:$0xff]  }
  0xb0   : > { %2775 = vmatpush3.bf16.msra.mxu0 %v3109_v26  ;;  %v3185_v26 = vld [vmem:[%s3536_s27 + $0x130] ss:$68 sps:$4 sm:$0xff]   ;;  %v3188_v29 = vld [vmem:[#allocation5 + $0x3e0] sm:$0xff]  }
  0xb1   : > { %2815 = vmatpush3.bf16.msra.mxu1 %v3110_v27  ;;  %2776 = vmatprep.subr.bf16.mxu0 %v3117_v32  ;;  %v3186_v27 = vld [vmem:[%s3536_s27 + $0x138] ss:$68 sps:$4 sm:$0xff]   ;;  %v3191_v32 = vld [vmem:[#allocation5 + $0x368] sm:$0xff]  }
  0xb2   : > { %2816 = vmatprep.subr.bf16.mxu1 %v3118_v33  ;;  %v3192_v33 = vld [vmem:[#allocation5 + $0x3e8] sm:$0xff]  }
  0xb3   : > { %1861 = vmatmul.mubr.bf16.gmra.mrb[20].mxu0 %v3115_v30  ;;  %v3189_v30 = vld [vmem:[#allocation5 + $0x320] sm:$0xff]  }
  0xb4   : > { %1926 = vmatmul.mubr.bf16.gmra.mrb[20].mxu1 %v3116_v31  ;;  %2777 = vmatpush3.bf16.msra.mxu0 %v3119_v34  ;;  %v3190_v31 = vld [vmem:[#allocation5 + $0x3a0] sm:$0xff]   ;;  %v3193_v34 = vld [vmem:[#allocation5 + $0x328] sm:$0xff]  }
  0xb5   : > { %2817 = vmatpush3.bf16.msra.mxu1 %v3120_v35  ;;  %2778 = vmatprep.subr.bf16.mxu0 %v3121_v36  ;;  %v3194_v35 = vld [vmem:[#allocation5 + $0x3a8] sm:$0xff]   ;;  %v3195_v36 = vld [vmem:[%s3536_s27 + $0x1bc] ss:$68 sps:$4 sm:$0xff]  }
  0xb6   : > { %2818 = vmatprep.subr.bf16.mxu1 %v3122_v37  ;;  %1868 = vmatprep.mubr.bf16.mxu0 %v3125_v40  ;;  %v3197_v37 = vld [vmem:[%s3536_s27 + $0x1c4] ss:$68 sps:$4 sm:$0xff]   ;;  %v3201_v40 = vld [vmem:[#allocation5 + $0x370] sm:$0xff]  }
  0xb7   : > { %1933 = vmatprep.mubr.bf16.mxu1 %v3127_v41  ;;  %v3202_v41 = vld [vmem:[#allocation5 + $0x3f0] sm:$0xff]  }
  0xb8   : > { %2779 = vmatpush3.bf16.msra.mxu0 %v3123_v38  ;;  %v3199_v38 = vld [vmem:[%s3536_s27 + $0x1b8] ss:$68 sps:$4 sm:$0xff]  }
  0xb9   : > { %2819 = vmatpush3.bf16.msra.mxu1 %v3124_v39  ;;  %2780 = vmatprep.subr.bf16.mxu0 %v3131_v44  ;;  %v3200_v39 = vld [vmem:[%s3536_s27 + $0x1c0] ss:$68 sps:$4 sm:$0xff]   ;;  %v3205_v44 = vld [vmem:[#allocation5 + $0x378] sm:$0xff]  }
  0xba   : > { %2820 = vmatprep.subr.bf16.mxu1 %v3132_v45  ;;  %v3206_v45 = vld [vmem:[#allocation5 + $0x3f8] sm:$0xff]  }
  0xbb   : > { %1869 = vmatmul.mubr.bf16.gmra.mrb[24].mxu0 %v3129_v42  ;;  %v3203_v42 = vld [vmem:[#allocation5 + $0x330] sm:$0xff]  }
  0xbc   : > { %1934 = vmatmul.mubr.bf16.gmra.mrb[24].mxu1 %v3130_v43  ;;  %2781 = vmatpush3.bf16.msra.mxu0 %v3133_v46  ;;  %v3204_v43 = vld [vmem:[#allocation5 + $0x3b0] sm:$0xff]   ;;  %v3207_v46 = vld [vmem:[#allocation5 + $0x338] sm:$0xff]  }
  0xbd   : > { %2821 = vmatpush3.bf16.msra.mxu1 %v3134_v47  ;;  %2782 = vmatprep.subr.bf16.mxu0 %v3135_v48  ;;  %v3208_v47 = vld [vmem:[#allocation5 + $0x3b8] sm:$0xff]   ;;  %v3209_v48 = vld [vmem:[%s3536_s27 + $0x30] ss:$68 sps:$4 sm:$0xff]  }
  0xbe   : > { %2822 = vmatprep.subr.bf16.mxu1 %v3136_v49  ;;  %1876 = vmatprep.mubr.bf16.mxu0 %v3139_v52  ;;  %v3211_v49 = vld [vmem:[%s3536_s27 + $0x34] ss:$68 sps:$4 sm:$0xff]  }
  0xbf   : > { %1941 = vmatprep.mubr.bf16.mxu1 %v3141_v53  ;;  %v3212_v52 = vld [vmem:[%s3536_s27 + $0x38] ss:$68 sps:$4 sm:$0xff]  }
  0xc0   : > { %2783 = vmatpush3.bf16.msra.mxu0 %v3137_v50  ;;  %v3372_v50 = vmov 0   ;;  %v3214_v53 = vld [vmem:[%s3536_s27 + $0x3c] ss:$68 sps:$4 sm:$0xff]  }
  0xc1   : > { %2823 = vmatpush3.bf16.msra.mxu1 %v3138_v51  ;;  %2784 = vmatprep.subr.bf16.mxu0 %v3145_v56  ;;  %v1686_v51 = vsel %vm1684_vm0, 65535, %v3372_v50 }
  0xc2   : > { %2824 = vmatprep.subr.bf16.mxu1 %v3146_v57  ;;  %v3218_v57 = vld [vmem:[%s3536_s27 + $0xc4] ss:$68 sps:$4 sm:$0xff]  }
  0xc3   : > { %1877 = vmatmul.mubr.bf16.gmra.mrb[28].mxu0 %v3143_v54  ;;  %v3215_v54 = vld [vmem:[#allocation5 + $0x400] ss:$0 sps:$4 sm:$0x11]  }
  0xc4   : > { %1942 = vmatmul.mubr.bf16.gmra.mrb[28].mxu1 %v3144_v55  ;;  %2785 = vmatpush3.bf16.msra.mxu0 %v3147_v58  ;;  %v3216_v55 = vld [vmem:[%s3536_s27 + $0xbc] ss:$68 sps:$4 sm:$0xff]   ;;  %v1688_v56 = vand.u32 %v3215_v54, %v1686_v51 }
  0xc5   : > { %2825 = vmatpush3.bf16.msra.mxu1 %v3148_v59  ;;  %2786 = vmatprep.subr.bf16.mxu0 %v3149_v60  ;;  %v3220_v58 = vld [vmem:[%s3536_s27 + $0xb8] ss:$68 sps:$4 sm:$0xff]   ;;  %v3221_v59 = vld [vmem:[%s3536_s27 + $0xc0] ss:$68 sps:$4 sm:$0xff]  }
  0xc6   : > { %2826 = vmatprep.subr.bf16.mxu1 %v3150_v61  ;;  %1982 = vmatprep.mubr.bf16.mxu0 %v3155_v1  ;;  %v3222_v60 = vld [vmem:[%s3536_s27 + $0x144] ss:$68 sps:$4 sm:$0xff]   ;;  %v3224_v61 = vld [vmem:[%s3536_s27 + $0x14c] ss:$68 sps:$4 sm:$0xff]   ;;  %v3230_v1 = vld [vmem:[%s3536_s27 + $0x1d4] ss:$68 sps:$4 sm:$0xff]  }
  0xc7   : > { %2047 = vmatprep.mubr.bf16.mxu1 %v3158_v3  ;;  %v3233_v3 = vld [vmem:[%s3536_s27 + $0x1d0] ss:$68 sps:$4 sm:$0xff]  }
  0xc8   : > { %2787 = vmatpush3.bf16.msra.mxu0 %v3151_v62  ;;  %v3226_v62 = vld [vmem:[%s3536_s27 + $0x140] ss:$68 sps:$4 sm:$0xff]  }
  0xc9   : > { %2827 = vmatpush3.bf16.msra.mxu1 %v3152_v63  ;;  %2852 = vmatprep.subr.bf16.mxu0 %v3159_v4  ;;  %v3227_v63 = vld [vmem:[%s3536_s27 + $0x148] ss:$68 sps:$4 sm:$0xff]   ;;  %v3234_v4 = vld [vmem:[%s3536_s27 + $0x40] ss:$68 sps:$4 sm:$0xff]  }
  0xca   : > { %2892 = vmatprep.subr.bf16.mxu1 %v3160_v5  ;;  %v3235_v5 = vld [vmem:[%s3536_s27 + $0x150] ss:$68 sps:$4 sm:$0xff]  }
  0xcb   : > { %1983 = vmatmul.mubr.bf16.vlgmr.msra.gmra.mrb[32].mxu0 %v3153_v0  ;;  %v3228_v0 = vld [vmem:[%s3536_s27 + $0x1cc] ss:$68 sps:$4 sm:$0xff]  }
  0xcc   : > { %2048 = vmatmul.mubr.bf16.vlgmr.msra.gmra.mrb[32].mxu1 %v3156_v2  ;;  %2853 = vmatpush3.bf16.msra.mxu0 %v3161_v6  ;;  %v3232_v2 = vld [vmem:[%s3536_s27 + $0x1c8] ss:$68 sps:$4 sm:$0xff]  }
  0xcd   : > { %2893 = vmatpush3.bf16.msra.mxu1 %v3162_v7  ;;  %2854 = vmatprep.subr.bf16.mxu0 %v3163_v8  ;;  %v3236_v6 = vld [vmem:[%s3536_s27 + $0xc8] ss:$68 sps:$4 sm:$0xff]   ;;  %v3237_v7 = vld [vmem:[%s3536_s27 + $0x1d8] ss:$68 sps:$4 sm:$0xff]  }
  0xce   : > { %2894 = vmatprep.subr.bf16.mxu1 %v3164_v9  ;;  %1990 = vmatprep.mubr.bf16.mxu0 %v3167_v12 }
  0xcf   : > { %2055 = vmatprep.mubr.bf16.mxu1 %v3169_v13 }
  0xd0   : > { %2855 = vmatpush3.bf16.msra.mxu0 %v3165_v10  ;;  %v2400_v10 = vld [vmem:[%s3719_s2] ss:$0 sm:$0xff] }
  0xd1   : > { %2895 = vmatpush3.bf16.msra.mxu1 %v3166_v11  ;;  %2856 = vmatprep.subr.bf16.mxu0 %v3173_v16 }
  0xd2   : > { %2896 = vmatprep.subr.bf16.mxu1 %v3174_v17 }
  0xd3   : > { %1991 = vmatmul.mubr.bf16.gmra.mrb[36].mxu0 %v3171_v14 }
  0xd4   : > { %2056 = vmatmul.mubr.bf16.gmra.mrb[36].mxu1 %v3172_v15  ;;  %2857 = vmatpush3.bf16.msra.mxu0 %v3175_v18 }
  0xd5   : > { %2897 = vmatpush3.bf16.msra.mxu1 %v3176_v19  ;;  %2858 = vmatprep.subr.bf16.mxu0 %v3177_v20 }
  0xd6   : > { %2898 = vmatprep.subr.bf16.mxu1 %v3178_v21  ;;  %1998 = vmatprep.mubr.bf16.mxu0 %v3181_v24 }
  0xd7   : > { %2063 = vmatprep.mubr.bf16.mxu1 %v3183_v25 }
  0xd8   : > { %2859 = vmatpush3.bf16.msra.mxu0 %v3179_v22 }
  0xd9   : > { %2899 = vmatpush3.bf16.msra.mxu1 %v3180_v23  ;;  %2860 = vmatprep.subr.bf16.mxu0 %v3187_v28 }
  0xda   : > { %2900 = vmatprep.subr.bf16.mxu1 %v3188_v29 }
  0xdb   : > { %1999 = vmatmul.mubr.bf16.gmra.mrb[40].mxu0 %v3185_v26 }
  0xdc   : > { %2064 = vmatmul.mubr.bf16.gmra.mrb[40].mxu1 %v3186_v27  ;;  %2861 = vmatpush3.bf16.msra.mxu0 %v3189_v30 }
  0xdd   : > { %2901 = vmatpush3.bf16.msra.mxu1 %v3190_v31  ;;  %2862 = vmatprep.subr.bf16.mxu0 %v3191_v32 }
  0xde   : > { %2902 = vmatprep.subr.bf16.mxu1 %v3192_v33  ;;  %2006 = vmatprep.mubr.bf16.mxu0 %v3195_v36 }
  0xdf   : > { %2071 = vmatprep.mubr.bf16.mxu1 %v3197_v37 }
  0xe0   : > { %2863 = vmatpush3.bf16.msra.mxu0 %v3193_v34 }
  0xe1   : > { %2903 = vmatpush3.bf16.msra.mxu1 %v3194_v35  ;;  %2864 = vmatprep.subr.bf16.mxu0 %v3201_v40 }
  0xe2   : > { %2904 = vmatprep.subr.bf16.mxu1 %v3202_v41 }
  0xe3   : > { %2007 = vmatmul.mubr.bf16.gmra.mrb[44].mxu0 %v3199_v38 }
  0xe4   : > { %2072 = vmatmul.mubr.bf16.gmra.mrb[44].mxu1 %v3200_v39  ;;  %2865 = vmatpush3.bf16.msra.mxu0 %v3203_v42 }
  0xe5   : > { %2905 = vmatpush3.bf16.msra.mxu1 %v3204_v43  ;;  %2866 = vmatprep.subr.bf16.mxu0 %v3205_v44 }
  0xe6   : > { %2906 = vmatprep.subr.bf16.mxu1 %v3206_v45  ;;  %2112 = vmatprep.mubr.bf16.mxu0 %v3211_v49 }
  0xe7   : > { %2177 = vmatprep.mubr.bf16.mxu1 %v3214_v53 }
  0xe8   : > { %2867 = vmatpush3.bf16.msra.mxu0 %v3207_v46 }
  0xe9   : > { %2907 = vmatpush3.bf16.msra.mxu1 %v3208_v47  ;;  %2937 = vmatprep.subr.bf16.mxu0 %v1688_v56 }
  0xea   : > { %2947 = vmatprep.subr.bf16.mxu1 %v1688_v56 }
  0xeb   : > { %2113 = vmatmul.mubr.bf16.vlgmr.msra.gmra.mrb[48].mxu0 %v3209_v48 }
  0xec   : > { %2178 = vmatmul.mubr.bf16.vlgmr.msra.gmra.mrb[48].mxu1 %v3212_v52  ;;  %2120 = vmatprep.mubr.bf16.mxu0 %v3216_v55 }
  0xed   : > { %2938 = vmatpush3.bf16.msra.mxu0 %v1688_v56  ;;  %2948 = vmatpush3.bf16.msra.mxu1 %v1688_v56 }
  0xee   : > { %2185 = vmatprep.mubr.bf16.mxu1 %v3218_v57 }
  0xf3   : > { %2121 = vmatmul.mubr.bf16.gmra.mrb[52].mxu0 %v3220_v58 }
  0xf4   : > { %2186 = vmatmul.mubr.bf16.gmra.mrb[52].mxu1 %v3221_v59  ;;  %2128 = vmatprep.mubr.bf16.mxu0 %v3222_v60 }
  0xf5   : > { %2193 = vmatprep.mubr.bf16.mxu1 %v3224_v61 }
  0xfb   : > { %2129 = vmatmul.mubr.bf16.gmra.mrb[56].mxu0 %v3226_v62 }
  0xfc   : > { %2194 = vmatmul.mubr.bf16.gmra.mrb[56].mxu1 %v3227_v63  ;;  %2136 = vmatprep.mubr.bf16.mxu0 %v3228_v0 }
  0xfd   : > { %2201 = vmatprep.mubr.bf16.mxu1 %v3230_v1 }
 0x103   : > { %2137 = vmatmul.mubr.bf16.gmra.mrb[60].mxu0 %v3232_v2 }
 0x104   : > { %2202 = vmatmul.mubr.bf16.gmra.mrb[60].mxu1 %v3233_v3  ;;  %2939 = vmatprep.mubr.msk.bf16.mxu0 %vm1671_vm1, %v3234_v4 }
 0x105   : > { %2943 = vmatprep.mubr.msk.bf16.mxu1 %vm1671_vm1, %v3235_v5 }
 0x10b   : > { %2940 = vmatmul.mubr.msk.bf16.vlgmr.msra.gmra.mrb[64].mxu0 %vm1671_vm1, %v3236_v6 }
 0x10c   : > { %2944 = vmatmul.mubr.msk.bf16.vlgmr.msra.gmra.mrb[64].mxu1 %vm1671_vm1, %v3237_v7 }
 0x15e   : > { %v2628_v8 = vpop.f32.mrb[0].mxu0 }
 0x15f   : > { %v2668_v9 = vpop.f32.mrb[0].mxu1  ;;  %v2629_v11 = vpop.f32.mrb[1].mxu0 }
 0x160   : > { %v2630_v12 = vadd.f32 %v2629_v11, %v2628_v8  ;;  %v2669_v13 = vpop.f32.mrb[1].mxu1  ;;  %v2631_v14 = vpop.f32.mrb[2].mxu0 }
 0x161   : > { %v2670_v15 = vadd.f32 %v2669_v13, %v2668_v9  ;;  %v2671_v16 = vpop.f32.mrb[2].mxu1  ;;  %v2632_v17 = vpop.f32.mrb[3].mxu0 }
 0x162   : > { %v1725_v18 = vadd.f32 %v2630_v12, %v2400_v10  ;;  %v2633_v19 = vadd.f32 %v2632_v17, %v2631_v14  ;;  %v2672_v20 = vpop.f32.mrb[3].mxu1 }
 0x163   : > { %v2673_v21 = vadd.f32 %v2672_v20, %v2671_v16 }
 0x164   : > { %v1790_v22 = vadd.f32 %v2670_v15, %v1725_v18  ;;  %v1728_v23 = vadd.f32 %v2633_v19, %v2400_v10 }
 0x166   : > { %v1793_v24 = vadd.f32 %v2673_v21, %v1728_v23  ;;  %v2634_v25 = vpop.f32.mrb[4].mxu0 }
 0x167   : > { %v2674_v26 = vpop.f32.mrb[4].mxu1  ;;  %v2635_v27 = vpop.f32.mrb[5].mxu0 }
 0x168   : > { %v2636_v28 = vadd.f32 %v2635_v27, %v2634_v25  ;;  %v2675_v29 = vpop.f32.mrb[5].mxu1  ;;  %v2637_v30 = vpop.f32.mrb[6].mxu0 }
 0x169   : > { %v2676_v31 = vadd.f32 %v2675_v29, %v2674_v26  ;;  %v2677_v32 = vpop.f32.mrb[6].mxu1  ;;  %v2638_v33 = vpop.f32.mrb[7].mxu0 }
 0x16a   : > { %v1733_v34 = vadd.f32 %v2636_v28, %v2400_v10  ;;  %v2639_v35 = vadd.f32 %v2638_v33, %v2637_v30  ;;  %v2678_v36 = vpop.f32.mrb[7].mxu1 }
 0x16b   : > { %v2679_v37 = vadd.f32 %v2678_v36, %v2677_v32 }
 0x16c   : > { %v1798_v38 = vadd.f32 %v2676_v31, %v1733_v34  ;;  %v1736_v39 = vadd.f32 %v2639_v35, %v2400_v10 }
 0x16e   : > { %v3617_v40 = vadd.f32 %v2679_v37, %v1736_v39  ;;  %v2640_v41 = vpop.f32.mrb[8].mxu0 }
 0x16f   : > { %v2680_v42 = vpop.f32.mrb[8].mxu1  ;;  %v2641_v43 = vpop.f32.mrb[9].mxu0 }
 0x170   : > { %v2642_v44 = vadd.f32 %v2641_v43, %v2640_v41  ;;  %v2681_v45 = vpop.f32.mrb[9].mxu1  ;;  %v2643_v46 = vpop.f32.mrb[10].mxu0 }
 0x171   : > { %v2682_v47 = vadd.f32 %v2681_v45, %v2680_v42  ;;  %v2683_v48 = vpop.f32.mrb[10].mxu1  ;;  %v2644_v49 = vpop.f32.mrb[11].mxu0 }
 0x172   : > { %v1741_v50 = vadd.f32 %v2642_v44, %v2400_v10  ;;  %v2645_v51 = vadd.f32 %v2644_v49, %v2643_v46  ;;  %v2684_v52 = vpop.f32.mrb[11].mxu1 }
 0x173   : > { %v2685_v53 = vadd.f32 %v2684_v52, %v2683_v48 }
 0x174   : > { %v1806_v54 = vadd.f32 %v2682_v47, %v1741_v50  ;;  %v1744_v55 = vadd.f32 %v2645_v51, %v2400_v10 }
 0x176   : > { %v3619_v56 = vadd.f32 %v2685_v53, %v1744_v55  ;;  %v2646_v57 = vpop.f32.mrb[12].mxu0 }
 0x177   : > { %v2686_v58 = vpop.f32.mrb[12].mxu1  ;;  %v2647_v59 = vpop.f32.mrb[13].mxu0 }
 0x178   : > { %v2687_v60 = vpop.f32.mrb[13].mxu1  ;;  %v2648_v61 = vadd.f32 %v2647_v59, %v2646_v57  ;;  %v2649_v63 = vpop.f32.mrb[14].mxu0 }
 0x179   : > { %v2688_v62 = vadd.f32 %v2687_v60, %v2686_v58  ;;  %v2689_v0 = vpop.f32.mrb[14].mxu1  ;;  %v2650_v1 = vpop.f32.mrb[15].mxu0 }
 0x17a   : > { %v2690_v2 = vpop.f32.mrb[15].mxu1  ;;  %v1749_v3 = vadd.f32 %v2648_v61, %v2400_v10  ;;  %v2651_v4 = vadd.f32 %v2650_v1, %v2649_v63 }
 0x17b   : > { %v2691_v5 = vadd.f32 %v2690_v2, %v2689_v0 }
 0x17c   : > { %v1814_v6 = vadd.f32 %v2688_v62, %v1749_v3  ;;  %v1752_v7 = vadd.f32 %v2651_v4, %v2400_v10 }
 0x17e   : > { %v3621_v8 = vadd.f32 %v2691_v5, %v1752_v7  ;;  %v2708_v9 = vpop.f32.mrb[16].mxu0 }
 0x17f   : > { %v2709_v11 = vpop.f32.mrb[17].mxu0  ;;  %v2748_v12 = vpop.f32.mrb[16].mxu1 }
 0x180   : > { %v2710_v13 = vadd.f32 %v2709_v11, %v2708_v9  ;;  %v2711_v14 = vpop.f32.mrb[18].mxu0  ;;  %v2749_v15 = vpop.f32.mrb[17].mxu1 }
 0x181   : > { %v2712_v16 = vpop.f32.mrb[19].mxu0  ;;  %v2750_v18 = vadd.f32 %v2749_v15, %v2748_v12  ;;  %v2751_v19 = vpop.f32.mrb[18].mxu1 }
 0x182   : > { %v1855_v17 = vadd.f32 %v2710_v13, %v1790_v22  ;;  %v2713_v20 = vadd.f32 %v2712_v16, %v2711_v14  ;;  %v2752_v21 = vpop.f32.mrb[19].mxu1 }
 0x183   : > { %v2753_v26 = vadd.f32 %v2752_v21, %v2751_v19 }
 0x184   : > { %v1920_v23 = vadd.f32 %v2750_v18, %v1855_v17  ;;  %v1858_v25 = vadd.f32 %v2713_v20, %v1793_v24 }
 0x186   : > { %v3623_v27 = vadd.f32 %v2753_v26, %v1858_v25  ;;  %v2714_v10 = vpop.f32.mrb[20].mxu0 }
 0x187   : > { %v2754_v28 = vpop.f32.mrb[20].mxu1  ;;  %v2715_v29 = vpop.f32.mrb[21].mxu0 }
 0x188   : > { %v2716_v30 = vadd.f32 %v2715_v29, %v2714_v10  ;;  %v2755_v31 = vpop.f32.mrb[21].mxu1  ;;  %v2717_v32 = vpop.f32.mrb[22].mxu0 }
 0x189   : > { %v2756_v33 = vadd.f32 %v2755_v31, %v2754_v28  ;;  %v2757_v34 = vpop.f32.mrb[22].mxu1  ;;  %v2718_v35 = vpop.f32.mrb[23].mxu0 }
 0x18a   : > { %v1863_v36 = vadd.f32 %v2716_v30, %v1798_v38  ;;  %v2719_v22 = vadd.f32 %v2718_v35, %v2717_v32  ;;  %v2758_v37 = vpop.f32.mrb[23].mxu1 }
 0x18b   : > { %v2759_v39 = vadd.f32 %v2758_v37, %v2757_v34 }
 0x18c   : > { %v1928_v41 = vadd.f32 %v2756_v33, %v1863_v36  ;;  %v1866_v42 = vadd.f32 %v2719_v22, %v3617_v40 }
 0x18e   : > { %v3626_v24 = vadd.f32 %v2759_v39, %v1866_v42  ;;  %v2720_v43 = vpop.f32.mrb[24].mxu0 }
 0x18f   : > { %v2760_v44 = vpop.f32.mrb[24].mxu1  ;;  %v2721_v45 = vpop.f32.mrb[25].mxu0 }
 0x190   : > { %v2761_v46 = vpop.f32.mrb[25].mxu1  ;;  %v2722_v47 = vadd.f32 %v2721_v45, %v2720_v43  ;;  %v2723_v49 = vpop.f32.mrb[26].mxu0 }
 0x191   : > { %v2762_v48 = vadd.f32 %v2761_v46, %v2760_v44  ;;  %v2763_v50 = vpop.f32.mrb[26].mxu1  ;;  %v2724_v51 = vpop.f32.mrb[27].mxu0 }
 0x192   : > { %v2764_v52 = vpop.f32.mrb[27].mxu1  ;;  %v1871_v53 = vadd.f32 %v2722_v47, %v1806_v54  ;;  %v2725_v38 = vadd.f32 %v2724_v51, %v2723_v49 }
 0x193   : > { %v2765_v55 = vadd.f32 %v2764_v52, %v2763_v50 }
 0x194   : > { %v1936_v57 = vadd.f32 %v2762_v48, %v1871_v53  ;;  %v1874_v58 = vadd.f32 %v2725_v38, %v3619_v56 }
 0x196   : > { %v3629_v59 = vadd.f32 %v2765_v55, %v1874_v58  ;;  %v2726_v40 = vpop.f32.mrb[28].mxu0 }
 0x197   : > { %v2766_v60 = vpop.f32.mrb[28].mxu1  ;;  %v2727_v61 = vpop.f32.mrb[29].mxu0 }
 0x198   : > { %v2728_v62 = vadd.f32 %v2727_v61, %v2726_v40  ;;  %v2767_v63 = vpop.f32.mrb[29].mxu1  ;;  %v2729_v0 = vpop.f32.mrb[30].mxu0 }
 0x199   : > { %v2768_v1 = vadd.f32 %v2767_v63, %v2766_v60  ;;  %v2769_v2 = vpop.f32.mrb[30].mxu1  ;;  %v2730_v3 = vpop.f32.mrb[31].mxu0 }
 0x19a   : > { %v1879_v4 = vadd.f32 %v2728_v62, %v1814_v6  ;;  %v2731_v5 = vadd.f32 %v2730_v3, %v2729_v0  ;;  %v2770_v7 = vpop.f32.mrb[31].mxu1 }
 0x19b   : > { %v2771_v54 = vadd.f32 %v2770_v7, %v2769_v2 }
 0x19c   : > { %v1944_v9 = vadd.f32 %v2768_v1, %v1879_v4  ;;  %v1882_v11 = vadd.f32 %v2731_v5, %v3621_v8 }
 0x19e   : > { %v3632_v12 = vadd.f32 %v2771_v54, %v1882_v11  ;;  %v2788_v56 = vpop.f32.mrb[32].mxu0 }
 0x19f   : > { %v2828_v13 = vpop.f32.mrb[32].mxu1  ;;  %v2789_v14 = vpop.f32.mrb[33].mxu0 }
 0x1a0   : > { %v2790_v15 = vadd.f32 %v2789_v14, %v2788_v56  ;;  %v2829_v16 = vpop.f32.mrb[33].mxu1  ;;  %v2791_v17 = vpop.f32.mrb[34].mxu0 }
 0x1a1   : > { %v2830_v18 = vadd.f32 %v2829_v16, %v2828_v13  ;;  %v2831_v19 = vpop.f32.mrb[34].mxu1  ;;  %v2792_v20 = vpop.f32.mrb[35].mxu0 }
 0x1a2   : > { %v1985_v21 = vadd.f32 %v2790_v15, %v1920_v23  ;;  %v2793_v25 = vadd.f32 %v2792_v20, %v2791_v17  ;;  %v2832_v6 = vpop.f32.mrb[35].mxu1 }
 0x1a3   : > { %v2833_v26 = vadd.f32 %v2832_v6, %v2831_v19 }
 0x1a4   : > { %v2050_v10 = vadd.f32 %v2830_v18, %v1985_v21  ;;  %v1988_v28 = vadd.f32 %v2793_v25, %v3623_v27 }
 0x1a6   : > { %v2053_v29 = vadd.f32 %v2833_v26, %v1988_v28  ;;  %v2794_v8 = vpop.f32.mrb[36].mxu0 }
 0x1a7   : > { %v2834_v30 = vpop.f32.mrb[36].mxu1  ;;  %v2795_v31 = vpop.f32.mrb[37].mxu0 }
 0x1a8   : > { %v2835_v32 = vpop.f32.mrb[37].mxu1  ;;  %v2796_v33 = vadd.f32 %v2795_v31, %v2794_v8  ;;  %v2797_v35 = vpop.f32.mrb[38].mxu0 }
 0x1a9   : > { %v2836_v34 = vadd.f32 %v2835_v32, %v2834_v30  ;;  %v2837_v36 = vpop.f32.mrb[38].mxu1  ;;  %v2798_v22 = vpop.f32.mrb[39].mxu0 }
 0x1aa   : > { %v2838_v37 = vpop.f32.mrb[39].mxu1  ;;  %v1993_v39 = vadd.f32 %v2796_v33, %v1928_v41  ;;  %v2799_v42 = vadd.f32 %v2798_v22, %v2797_v35 }
 0x1ab   : > { %v2839_v23 = vadd.f32 %v2838_v37, %v2837_v36 }
 0x1ac   : > { %v2058_v43 = vadd.f32 %v2836_v34, %v1993_v39  ;;  %v1996_v44 = vadd.f32 %v2799_v42, %v3626_v24 }
 0x1ae   : > { %v2061_v45 = vadd.f32 %v2839_v23, %v1996_v44  ;;  %v2800_v46 = vpop.f32.mrb[40].mxu0 }
 0x1af   : > { %v2840_v27 = vpop.f32.mrb[40].mxu1  ;;  %v2801_v47 = vpop.f32.mrb[41].mxu0 }
 0x1b0   : > { %v2802_v48 = vadd.f32 %v2801_v47, %v2800_v46  ;;  %v2841_v49 = vpop.f32.mrb[41].mxu1  ;;  %v2803_v50 = vpop.f32.mrb[42].mxu0 }
 0x1b1   : > { %v2842_v51 = vadd.f32 %v2841_v49, %v2840_v27  ;;  %v2843_v52 = vpop.f32.mrb[42].mxu1  ;;  %v2804_v53 = vpop.f32.mrb[43].mxu0 }
 0x1b2   : > { %v2001_v38 = vadd.f32 %v2802_v48, %v1936_v57  ;;  %v2805_v55 = vadd.f32 %v2804_v53, %v2803_v50  ;;  %v2844_v58 = vpop.f32.mrb[43].mxu1 }
 0x1b3   : > { %v2845_v40 = vadd.f32 %v2844_v58, %v2843_v52 }
 0x1b4   : > { %v2066_v41 = vadd.f32 %v2842_v51, %v2001_v38  ;;  %v2004_v60 = vadd.f32 %v2805_v55, %v3629_v59 }
 0x1b6   : > { %v2069_v61 = vadd.f32 %v2845_v40, %v2004_v60  ;;  %v2806_v62 = vpop.f32.mrb[44].mxu0 }
 0x1b7   : > { %v2846_v24 = vpop.f32.mrb[44].mxu1  ;;  %v2807_v63 = vpop.f32.mrb[45].mxu0 }
 0x1b8   : > { %v2808_v0 = vadd.f32 %v2807_v63, %v2806_v62  ;;  %v2847_v1 = vpop.f32.mrb[45].mxu1  ;;  %v2809_v2 = vpop.f32.mrb[46].mxu0 }
 0x1b9   : > { %v2848_v3 = vadd.f32 %v2847_v1, %v2846_v24  ;;  %v2849_v4 = vpop.f32.mrb[46].mxu1  ;;  %v2810_v5 = vpop.f32.mrb[47].mxu0 }
 0x1ba   : > { %v2009_v7 = vadd.f32 %v2808_v0, %v1944_v9  ;;  %v2811_v54 = vadd.f32 %v2810_v5, %v2809_v2  ;;  %v2850_v11 = vpop.f32.mrb[47].mxu1 }
 0x1bb   : > { %v2851_v57 = vadd.f32 %v2850_v11, %v2849_v4 }
 0x1bc   : > { %v2074_v56 = vadd.f32 %v2848_v3, %v2009_v7  ;;  %v2012_v13 = vadd.f32 %v2811_v54, %v3632_v12 }
 0x1be   : > { %v3638_v14 = vadd.f32 %v2851_v57, %v2012_v13  ;;  %v2868_v59 = vpop.f32.mrb[48].mxu0 }
 0x1bf   : > { %v2908_v15 = vpop.f32.mrb[48].mxu1  ;;  %v2869_v16 = vpop.f32.mrb[49].mxu0 }
 0x1c0   : > { %v2870_v17 = vadd.f32 %v2869_v16, %v2868_v59  ;;  %v2909_v18 = vpop.f32.mrb[49].mxu1  ;;  %v2871_v19 = vpop.f32.mrb[50].mxu0 }
 0x1c1   : > { %v2910_v20 = vadd.f32 %v2909_v18, %v2908_v15  ;;  %v2911_v21 = vpop.f32.mrb[50].mxu1  ;;  %v2872_v25 = vpop.f32.mrb[51].mxu0 }
 0x1c2   : > { %v2115_v6 = vadd.f32 %v2870_v17, %v2050_v10  ;;  %v2873_v26 = vadd.f32 %v2872_v25, %v2871_v19  ;;  %v2912_v9 = vpop.f32.mrb[51].mxu1 }
 0x1c3   : > { %v2913_v28 = vadd.f32 %v2912_v9, %v2911_v21 }
 0x1c4   : > { %v2118_v8 = vadd.f32 %v2873_v26, %v2053_v29  ;;  %v2180_v30 = vadd.f32 %v2910_v20, %v2115_v6 }
 0x1c6   : > { %v2874_v31 = vpop.f32.mrb[52].mxu0  ;;  %v3640_v32 = vadd.f32 %v2913_v28, %v2118_v8 }
 0x1c7   : > { %v2914_v12 = vpop.f32.mrb[52].mxu1  ;;  %v2875_v33 = vpop.f32.mrb[53].mxu0 }
 0x1c8   : > { %v2876_v34 = vadd.f32 %v2875_v33, %v2874_v31  ;;  %v2915_v35 = vpop.f32.mrb[53].mxu1  ;;  %v2877_v36 = vpop.f32.mrb[54].mxu0 }
 0x1c9   : > { %v2916_v22 = vadd.f32 %v2915_v35, %v2914_v12  ;;  %v2917_v37 = vpop.f32.mrb[54].mxu1  ;;  %v2878_v39 = vpop.f32.mrb[55].mxu0 }
 0x1ca   : > { %v2123_v42 = vadd.f32 %v2876_v34, %v2058_v43  ;;  %v2879_v23 = vadd.f32 %v2878_v39, %v2877_v36  ;;  %v2918_v44 = vpop.f32.mrb[55].mxu1 }
 0x1cb   : > { %v2919_v10 = vadd.f32 %v2918_v44, %v2917_v37 }
 0x1cc   : > { %v2126_v46 = vadd.f32 %v2879_v23, %v2061_v45  ;;  %v2188_v27 = vadd.f32 %v2916_v22, %v2123_v42 }
 0x1ce   : > { %v2880_v47 = vpop.f32.mrb[56].mxu0  ;;  %v2191_v29 = vadd.f32 %v2919_v10, %v2126_v46 }
 0x1cf   : > { %v2920_v48 = vpop.f32.mrb[56].mxu1  ;;  %v2881_v49 = vpop.f32.mrb[57].mxu0 }
 0x1d0   : > { %v2882_v50 = vadd.f32 %v2881_v49, %v2880_v47  ;;  %v2921_v51 = vpop.f32.mrb[57].mxu1  ;;  %v2883_v52 = vpop.f32.mrb[58].mxu0 }
 0x1d1   : > { %v2922_v53 = vadd.f32 %v2921_v51, %v2920_v48  ;;  %v2923_v38 = vpop.f32.mrb[58].mxu1  ;;  %v2884_v55 = vpop.f32.mrb[59].mxu0 }
 0x1d2   : > { %v2131_v58 = vadd.f32 %v2882_v50, %v2066_v41  ;;  %v2885_v40 = vadd.f32 %v2884_v55, %v2883_v52  ;;  %v2924_v60 = vpop.f32.mrb[59].mxu1 }
 0x1d3   : > { %v2925_v62 = vadd.f32 %v2924_v60, %v2923_v38 }
 0x1d4   : > { %v2134_v43 = vadd.f32 %v2885_v40, %v2069_v61  ;;  %v2196_v24 = vadd.f32 %v2922_v53, %v2131_v58 }
 0x1d6   : > { %v2886_v63 = vpop.f32.mrb[60].mxu0  ;;  %v2199_v45 = vadd.f32 %v2925_v62, %v2134_v43 }
 0x1d7   : > { %v2926_v0 = vpop.f32.mrb[60].mxu1  ;;  %v2887_v1 = vpop.f32.mrb[61].mxu0 }
 0x1d8   : > { %v2888_v2 = vadd.f32 %v2887_v1, %v2886_v63  ;;  %v2927_v3 = vpop.f32.mrb[61].mxu1  ;;  %v2889_v4 = vpop.f32.mrb[62].mxu0 }
 0x1d9   : > { %v2928_v5 = vadd.f32 %v2927_v3, %v2926_v0  ;;  %v2929_v7 = vpop.f32.mrb[62].mxu1  ;;  %v2890_v54 = vpop.f32.mrb[63].mxu0 }
 0x1da   : > { %v2139_v11 = vadd.f32 %v2888_v2, %v2074_v56  ;;  %v2891_v57 = vadd.f32 %v2890_v54, %v2889_v4  ;;  %v2930_v13 = vpop.f32.mrb[63].mxu1 }
 0x1db   : > { %v2931_v41 = vadd.f32 %v2930_v13, %v2929_v7 }
 0x1dc   : > { %v2142_v59 = vadd.f32 %v2891_v57, %v3638_v14  ;;  %v2204_v61 = vadd.f32 %v2928_v5, %v2139_v11 }
 0x1de   : > { %v2941_v15 = vpop.f32.mrb[64].mxu0  ;;  %v2207_v16 = vadd.f32 %v2931_v41, %v2142_v59 }
 0x1df   : > { %v2253_v17 = vadd.f32 %v2941_v15, %v2188_v27  ;;  %v2945_v18 = vpop.f32.mrb[64].mxu1  ;;  %v2244_v19 = vpop.f32.mrb[65].mxu0  ;;  %2290 = sbr.rel (!%p3735_p8) target bundleno = 514 (0x202), region = 44 }
 0x1e0   : > { %v2269_v20 = vadd.f32 %v2945_v18, %v2204_v61  ;;  %v2245_v21 = vadd.f32 %v2244_v19, %v2180_v30  ;;  %v2260_v25 = vpop.f32.mrb[65].mxu1  ;;  %v2942_v6 = vpop.f32.mrb[66].mxu0 }
 0x1e1   : > { %2277 = vst [vmem:[%s3644_s7 + $0x10] sm:$0xff] %v2253_v17  ;;  %v2261_v56 = vadd.f32 %v2260_v25, %v2196_v24  ;;  %v2256_v14 = vadd.f32 %v2942_v6, %v2191_v29  ;;  %v2946_v26 = vpop.f32.mrb[66].mxu1  ;;  %v2247_v9 = vpop.f32.mrb[67].mxu0 }
 0x1e2   : > { %2281 = vst [vmem:[%s3644_s7 + $0x30] sm:$0xff] %v2269_v20  ;;  %2275 = vst [vmem:[%s3644_s7] sm:$0xff] %v2245_v21  ;;  %v2272_v28 = vadd.f32 %v2946_v26, %v2207_v16  ;;  %v2248_v8 = vadd.f32 %v2247_v9, %v3640_v32  ;;  %v2263_v30 = vpop.f32.mrb[67].mxu1 }
 0x1e3   : > { %2279 = vst [vmem:[%s3644_s7 + $0x20] sm:$0xff] %v2261_v56  ;;  %2278 = vst [vmem:[%s3644_s7 + $0x18] sm:$0xff] %v2256_v14  ;;  %v2264_v31 = vadd.f32 %v2263_v30, %v2199_v45 }
 0x1e4   : > { %2282 = vst [vmem:[%s3644_s7 + $0x38] sm:$0xff] %v2272_v28  ;;  %2276 = vst [vmem:[%s3644_s7 + $0x8] sm:$0xff] %v2248_v8 }
 0x1e5   : > { %2280 = vst [vmem:[%s3644_s7 + $0x28] sm:$0xff] %v2264_v31 }
 0x1e6   : > { %s3744_s30 = smov (!%p2293_p9, %s2292_s30), 8 }
 0x1e7   : > { %s3659_s4 = sshll.u32 %s3744_s30, 7 }
 0x1e8   : > { %s2297_s5 = ssub.s32 1024, %s3659_s4 }
 0x1e9   : > { %2298 = vsyncadd %s2284_s8, %s2297_s5  ;;  %p2605_p10 = scmp.ne.s32.totalorder %s3659_s4, 0  ;;  %s2611_s24 = sshll.u32 %s3417_s16, 10 }
 0x1ea   : > { %s3669_s22 = scalar_lea.hbm %s3720_s3, %s2611_s24  ;;  %s2303_s9 = sshll.u32 %s3644_s7, 4  ;;  %s3672_s9 = int_to_ptr.vmem [resolvable:$true] %s2303_s9 }
 0x1eb   : > { %s3294_s10 = scalar_lea.vmem %s3672_s9, %s3659_s4  ;;  %s3373_s19 = smov [#allocation7]  }
 0x1ec   : > { %p3295_p1 = scmp.ne.s32.totalorder %s3672_s9, %s3294_s10  ;;  %s3298_s20 = sshll.u32 %s3373_s19, 4  ;;  %s3299_s20 = int_to_ptr.vmem [resolvable:$false] %s3298_s20 }
 0x1ed   : > { %s3300_s16 = scalar_lea.vmem %s3299_s20, 2048  ;;  %p3301_p4 = scmp.lt.s32.totalorder %s3672_s9, %s3299_s20 }
 0x1ee   : > { %p3296_p0 = pnand %p3295_p1, %p2605_p10  ;;  %p3302_p6 = scmp.lt.s32.totalorder %s3300_s16, %s3294_s10 }
 0x1f0   : > { %p3297_p7 = pneg %p3296_p0  ;;  %p3303_p11 = por %p3302_p6, %p3301_p4 }
 0x1f2   : > { %p3304_p13 = pnand %p3303_p11, %p3297_p7 }
 0x1f4   : > { %3307 = shalt.err (!%p3304_p13)
}
 0x1f5   : > { %s3308_s27 = scalar_lea.hbm %s3669_s22, %s3659_s4  ;;  %s3312_s6 = scalar_lea.hbm %s3720_s3, 2560 }
 0x1f6   : > { %p3309_p12 = scmp.ne.s32.totalorder %s3669_s22, %s3308_s27  ;;  %p3313_p3 = scmp.lt.u32.totalorder %s3669_s22, %s3720_s3 }
 0x1f7   : > { %p3314_p8 = scmp.lt.u32.totalorder %s3312_s6, %s3308_s27  ;;  %p3316_p1 = scmp.lt.u32.totalorder %s3308_s27, %s3669_s22 }
 0x1f8   : > { %p3310_p2 = pnand %p3309_p12, %p2605_p10 }
 0x1f9   : > { %p3315_p9 = por %p3314_p8, %p3313_p3 }
 0x1fa   : > { %p3311_p5 = pneg %p3310_p2 }
 0x1fb   : > { %p3317_p0 = por %p3316_p1, %p3315_p9 }
 0x1fd   : > { %p3318_p7 = pnand %p3317_p0, %p3311_p5 }
 0x1ff   : > { %3321 = shalt.err (!%p3318_p7)
}
 0x200   : > { %s3374_s30 = smov 128   ;;  %s3375_s5 = smov 8  }
 0x201   : > { %2309 = dma.vmem_to_hbm [thread:$0]  (%p2605_p10), %s3672_s9, %s3659_s4, %s3669_s22, %s2284_s8, %s3374_s30, %s3374_s30, %s3375_s5  }
 0x202 PF: > { %p2968_p4 = scmp.ge.s32.totalorder %s3364_s15, 2  ;;  %s2318_s24 = sand.u32 1, %s3352_s12  }
 0x203   : > { %p3736_p6 = scmp.ne.s32.totalorder %s3727_s25, 0  ;;  %s2319_s29 = scalar_lea.sflag [#allocation4], %s2318_s24 }
 0x205   : > { %p2963_p11 = pnand %p2968_p4, %p3736_p6 }
 0x207   : > { %3347 = dma.done.wait (!%p2963_p11), %s2319_s29, 1024  }
 0x208   : > { %3349 = vsyncadd (!%p2963_p11), %s2319_s29, 4294966272  ;;  %p17_p13 = scmp.ge.s32.totalorder %s3421_s18, 5   ;;  %s3737_s12 = smov %s3356_s13 }
 0x209   : > { %s3738_s13 = smov %s3360_s14  ;;  %s3739_s14 = smov %s3433_s21 }
 0x20a   : > { %s3740_s15 = smov %s3421_s18  ;;  %19 = sbr.rel (!%p17_p13) target bundleno = 6 (0x6), region = 81 }
 0x211   :  { %2324 = vsyncpa [#allocation3], 1 }
 0x212   :  { %2326 = vsyncpa [#allocation3 + $0x1], 1 }
 0x213   :  { %2327 = vsyncpa [#allocation6], 1 }
 0x214   :  { %2328 = vsyncpa [#allocation4], 1 }
 0x215   :  { %2330 = vsyncpa [#allocation4 + $0x1], 1 }

</bundles_post_ra>
